<compile_context>
chip_gen: v7x
topology: tpu7x:2x2x1
jax: 0.10.0
libtpu: 0.0.40
codegen_flags: <defaults>
</compile_context>

<pallas_src>
import functools

import jax
import jax.numpy as jnp
from jax.experimental import pallas as pl
from jax.experimental.pallas import tpu as pltpu

LANES = 128           # lane (fast) axis of one vreg
SUBLANES = 8          # sublane axis of one f32 vreg
MAX_TILE_ROWS = 1024  # (1024,128) f32 tile = 512 KiB; 2 inputs x 2 bufs = 2 MiB VMEM
MAX_CHUNKS = 2        # leading 'parallel' grid axis (v7x megacore)

# weights for the composite loss (deterministic "parameters" of the module)
W_BCE = 1.0
W_MSE = 0.5


def _cdiv(a, b):
    return -(-a // b)


def _round_up(a, b):
    return _cdiv(a, b) * b


def _composite_loss_kernel(x_ref, y_ref, acc_ref, *,
                           tile_rows, tiles_per_chunk, total_elems, needs_mask):
    """One (tile_rows, 128) tile of outputs/targets -> running per-lane sums.

    x_ref, y_ref : (tile_rows, LANES) VMEM tiles
    acc_ref      : (1, 2, SUBLANES, LANES) VMEM output block, resident across
                   the trailing 'arbitrary' grid axis (per-chunk accumulator).
                   acc[0,0] = per-lane partial sums of the BCE terms
                   acc[0,1] = per-lane partial sums of the MSE terms
    """
    t = pl.program_id(1)

    @pl.when(t == 0)
    def _():
        acc_ref[...] = jnp.zeros_like(acc_ref)

    x = x_ref[...].astype(jnp.float32)
    y = y_ref[...].astype(jnp.float32)

    # BCEWithLogitsLoss (numerically stable form):
    #   max(x, 0) - x*y + log(1 + exp(-|x|))
    bce_el = jnp.maximum(x, 0.0) - x * y + jnp.log1p(jnp.exp(-jnp.abs(x)))
    # MSELoss
    diff = x - y
    mse_el = diff * diff

    if needs_mask:
        # Zero contributions of the zero-padded tail so the mean stays exact.
        row_base = (pl.program_id(0) * tiles_per_chunk + t) * tile_rows
        row_ids = jax.lax.broadcasted_iota(jnp.int32, (tile_rows, LANES), 0) + row_base
        col_ids = jax.lax.broadcasted_iota(jnp.int32, (tile_rows, LANES), 1)
        mask = row_ids * LANES + col_ids < total_elems
        bce_el = jnp.where(mask, bce_el, 0.0)
        mse_el = jnp.where(mask, mse_el, 0.0)

    # Layout-preserving fold of rows into one (8,128) vreg-shaped slab:
    # pure VPU vreg adds, no per-step XLU reduce-to-scalar / SMEM round-trip.
    bce_p = jnp.sum(bce_el.reshape(tile_rows // SUBLANES, SUBLANES, LANES), axis=0)
    mse_p = jnp.sum(mse_el.reshape(tile_rows // SUBLANES, SUBLANES, LANES), axis=0)

    acc_ref[0, 0] += bce_p
    acc_ref[0, 1] += mse_p


def composite_loss(outputs, targets, w_bce=W_BCE, w_mse=W_MSE):
    """Pallas implementation of TorchCompositeLoss.forward.

    Returns (loss, values) where values mirrors self.values:
    values[0] = bcewithlogits mean, values[1] = mse mean.
    """
    assert outputs.shape == targets.shape
    total = 1
    for d in outputs.shape:
        total *= d

    # --- tiling / grid sizing (static, Python-level) ---
    rows = _cdiv(total, LANES)
    tile_rows = min(MAX_TILE_ROWS, _round_up(rows, SUBLANES))
    tiles_total = _cdiv(rows, tile_rows)
    num_chunks = min(MAX_CHUNKS, tiles_total)
    tiles_per_chunk = _cdiv(tiles_total, num_chunks)
    padded_rows = num_chunks * tiles_per_chunk * tile_rows
    padded_total = padded_rows * LANES
    needs_mask = padded_total != total

    # Keep inputs in their HBM dtype; the kernel upcasts to f32 internally.
    x_flat = outputs.reshape(-1)
    y_flat = targets.reshape(-1)
    if needs_mask:
        pad = padded_total - total
        x_flat = jnp.pad(x_flat, (0, pad))
        y_flat = jnp.pad(y_flat, (0, pad))
    x2 = x_flat.reshape(padded_rows, LANES)
    y2 = y_flat.reshape(padded_rows, LANES)

    kernel = functools.partial(
        _composite_loss_kernel,
        tile_rows=tile_rows, tiles_per_chunk=tiles_per_chunk,
        total_elems=total, needs_mask=needs_mask)

    partial_sums = pl.pallas_call(
        kernel,
        out_shape=jax.ShapeDtypeStruct(
            (num_chunks, 2, SUBLANES, LANES), jnp.float32),
        grid_spec=pltpu.PrefetchScalarGridSpec(
            num_scalar_prefetch=0,
            grid=(num_chunks, tiles_per_chunk),
            in_specs=[
                pl.BlockSpec((tile_rows, LANES),
                             lambda c, t: (c * tiles_per_chunk + t, 0)),
                pl.BlockSpec((tile_rows, LANES),
                             lambda c, t: (c * tiles_per_chunk + t, 0)),
            ],
            out_specs=pl.BlockSpec((1, 2, SUBLANES, LANES),
                                   lambda c, t: (c, 0, 0, 0)),
        ),
        compiler_params=pltpu.CompilerParams(
            dimension_semantics=("parallel", "arbitrary")),
    )(x2, y2)

    # Final cross-chunk / cross-lane reduction + weights (tiny, done by XLA).
    sums = jnp.sum(partial_sums, axis=(0, 2, 3))
    bce_mean = sums[0] / total
    mse_mean = sums[1] / total
    loss = w_bce * bce_mean + w_mse * mse_mean
    values = jnp.stack([bce_mean, mse_mean])
    return loss, values


def _reference(outputs, targets, w_bce=W_BCE, w_mse=W_MSE):
    x = outputs.astype(jnp.float32)
    y = targets.astype(jnp.float32)
    bce = jnp.mean(jnp.maximum(x, 0.0) - x * y + jnp.log1p(jnp.exp(-jnp.abs(x))))
    mse = jnp.mean((x - y) ** 2)
    return w_bce * bce + w_mse * mse, jnp.stack([bce, mse])


if __name__ == "__main__":
    key = jax.random.PRNGKey(0)

    # Primary case — NCHW like PyTorch: batch=2, channels=4, spatial=16x16.
    k1, k2 = jax.random.split(key)
    outputs = jax.random.normal(k1, (2, 4, 16, 16), dtype=jnp.float32)   # logits
    targets = jax.random.uniform(k2, (2, 4, 16, 16), dtype=jnp.float32)  # soft labels

    loss, values = composite_loss(outputs, targets)
    loss = jax.block_until_ready(loss)
    values = jax.block_until_ready(values)
    exp_loss, exp_vals = _reference(outputs, targets)
    assert jnp.allclose(loss, exp_loss, rtol=1e-5, atol=1e-5), (loss, exp_loss)
    assert jnp.allclose(values, exp_vals, rtol=1e-5, atol=1e-5), (values, exp_vals)

    # Secondary case — odd shape exercising padded-tail masking and the
    # two-chunk 'parallel' grid axis.
    k3, k4 = jax.random.split(k2)
    outputs2 = jax.random.normal(k3, (2, 4, 128, 160), dtype=jnp.float32)
    targets2 = jax.random.uniform(k4, (2, 4, 128, 160), dtype=jnp.float32)

    loss2, values2 = composite_loss(outputs2, targets2)
    loss2 = jax.block_until_ready(loss2)
    values2 = jax.block_until_ready(values2)
    exp_loss2, exp_vals2 = _reference(outputs2, targets2)
    assert jnp.allclose(loss2, exp_loss2, rtol=1e-5, atol=1e-5), (loss2, exp_loss2)
    assert jnp.allclose(values2, exp_vals2, rtol=1e-5, atol=1e-5), (values2, exp_vals2)

    print("KERNEL_OK")
</pallas_src>

<mosaic_0001>
module attributes {stable_mosaic.version = 11 : i64} {
  func.func @_composite_loss_kernel(%arg0: i32, %arg1: i32, %arg2: memref<16x128xf32, #tpu.memory_space<vmem>>, %arg3: memref<16x128xf32, #tpu.memory_space<vmem>>, %arg4: memref<1x2x8x128xf32, #tpu.memory_space<vmem>>) attributes {dimension_semantics = [#tpu.dimension_semantics<parallel>, #tpu.dimension_semantics<arbitrary>], iteration_bounds = array<i64: 1, 1>, scalar_prefetch = 0 : i64, scratch_operands = 0 : i64, tpu.core_type = #tpu.core_type<tc>, window_params = [{transform_indices = @transform_0, window_bounds = array<i64: 16, 128>}, {transform_indices = @transform_1, window_bounds = array<i64: 16, 128>}, {transform_indices = @transform_2, window_bounds = array<i64: 1, 2, 8, 128>}]} {
    %c0_i32 = arith.constant 0 : i32
    %0 = arith.cmpi eq, %arg1, %c0_i32 : i32
    %1 = arith.extui %0 : i1 to i32
    %c0_i32_0 = arith.constant 0 : i32
    %2 = arith.cmpi ne, %1, %c0_i32_0 : i32
    scf.if %2 {
      %cst_22 = arith.constant 0.000000e+00 : f32
      %33 = vector.broadcast %cst_22 : f32 to vector<1x2x8x128xf32>
      %c0_23 = arith.constant 0 : index
      %c0_24 = arith.constant 0 : index
      %c0_25 = arith.constant 0 : index
      %c0_26 = arith.constant 0 : index
      %34 = vector.load %arg4[%c0_23, %c0_24, %c0_25, %c0_26] : memref<1x2x8x128xf32, #tpu.memory_space<vmem>>, vector<1x2x8x128xf32>
      tpu.vector_store %arg4[%c0_23, %c0_24, %c0_25, %c0_26], %33 {strides = array<i32>} : memref<1x2x8x128xf32, #tpu.memory_space<vmem>>, vector<1x2x8x128xf32>,
    } else {
    }
    %c0 = arith.constant 0 : index
    %c0_1 = arith.constant 0 : index
    %3 = vector.load %arg2[%c0, %c0_1] : memref<16x128xf32, #tpu.memory_space<vmem>>, vector<16x128xf32>
    %c0_2 = arith.constant 0 : index
    %c0_3 = arith.constant 0 : index
    %4 = vector.load %arg3[%c0_2, %c0_3] : memref<16x128xf32, #tpu.memory_space<vmem>>, vector<16x128xf32>
    %cst = arith.constant 0.000000e+00 : f32
    %5 = vector.broadcast %cst : f32 to vector<16x128xf32>
    %6 = arith.maximumf %3, %5 : vector<16x128xf32>
    %7 = arith.mulf %3, %4 : vector<16x128xf32>
    %8 = arith.subf %6, %7 : vector<16x128xf32>
    %9 = math.absf %3 : vector<16x128xf32>
    %cst_4 = arith.constant 0.000000e+00 : f32
    %10 = vector.broadcast %cst_4 : f32 to vector<16x128xf32>
    %11 = arith.subf %10, %9 : vector<16x128xf32>
    %12 = math.exp %11 : vector<16x128xf32>
    %13 = math.log1p %12 : vector<16x128xf32>
    %14 = arith.addf %8, %13 : vector<16x128xf32>
    %15 = arith.subf %3, %4 : vector<16x128xf32>
    %16 = arith.mulf %15, %15 : vector<16x128xf32>
    %17 = vector.shape_cast %14 : vector<16x128xf32> to vector<2x8x128xf32>
    %cst_5 = arith.constant dense<0.000000e+00> : vector<8x128xf32>
    %18 = vector.multi_reduction <add>, %17, %cst_5 [0] : vector<2x8x128xf32> to vector<8x128xf32>
    %19 = vector.shape_cast %16 : vector<16x128xf32> to vector<2x8x128xf32>
    %cst_6 = arith.constant dense<0.000000e+00> : vector<8x128xf32>
    %20 = vector.multi_reduction <add>, %19, %cst_6 [0] : vector<2x8x128xf32> to vector<8x128xf32>
    %c0_7 = arith.constant 0 : index
    %c0_8 = arith.constant 0 : index
    %c0_9 = arith.constant 0 : index
    %c0_10 = arith.constant 0 : index
    %21 = vector.load %arg4[%c0_7, %c0_8, %c0_9, %c0_10] : memref<1x2x8x128xf32, #tpu.memory_space<vmem>>, vector<1x1x8x128xf32>
    %22 = vector.shape_cast %21 : vector<1x1x8x128xf32> to vector<8x128xf32>
    %23 = arith.addf %22, %18 : vector<8x128xf32>
    %c0_11 = arith.constant 0 : index
    %c0_12 = arith.constant 0 : index
    %c0_13 = arith.constant 0 : index
    %c0_14 = arith.constant 0 : index
    %24 = vector.load %arg4[%c0_11, %c0_12, %c0_13, %c0_14] : memref<1x2x8x128xf32, #tpu.memory_space<vmem>>, vector<1x1x8x128xf32>
    %25 = vector.shape_cast %24 : vector<1x1x8x128xf32> to vector<8x128xf32>
    %26 = vector.shape_cast %23 : vector<8x128xf32> to vector<1x1x8x128xf32>
    tpu.vector_store %arg4[%c0_11, %c0_12, %c0_13, %c0_14], %26 {strides = array<i32>} : memref<1x2x8x128xf32, #tpu.memory_space<vmem>>, vector<1x1x8x128xf32>,
    %c0_15 = arith.constant 0 : index
    %c1 = arith.constant 1 : index
    %c0_16 = arith.constant 0 : index
    %c0_17 = arith.constant 0 : index
    %27 = vector.load %arg4[%c0_15, %c1, %c0_16, %c0_17] : memref<1x2x8x128xf32, #tpu.memory_space<vmem>>, vector<1x1x8x128xf32>
    %28 = vector.shape_cast %27 : vector<1x1x8x128xf32> to vector<8x128xf32>
    %29 = arith.addf %28, %20 : vector<8x128xf32>
    %c0_18 = arith.constant 0 : index
    %c1_19 = arith.constant 1 : index
    %c0_20 = arith.constant 0 : index
    %c0_21 = arith.constant 0 : index
    %30 = vector.load %arg4[%c0_18, %c1_19, %c0_20, %c0_21] : memref<1x2x8x128xf32, #tpu.memory_space<vmem>>, vector<1x1x8x128xf32>
    %31 = vector.shape_cast %30 : vector<1x1x8x128xf32> to vector<8x128xf32>
    %32 = vector.shape_cast %29 : vector<8x128xf32> to vector<1x1x8x128xf32>
    tpu.vector_store %arg4[%c0_18, %c1_19, %c0_20, %c0_21], %32 {strides = array<i32>} : memref<1x2x8x128xf32, #tpu.memory_space<vmem>>, vector<1x1x8x128xf32>,
    return
  }
  func.func @transform_0(%arg0: i32, %arg1: i32) -> (i32, i32) {
    %c1_i32 = arith.constant 1 : i32
    %0 = arith.muli %arg0, %c1_i32 : i32
    %1 = arith.addi %0, %arg1 : i32
    %c0_i32 = arith.constant 0 : i32
    %c0_i32_0 = arith.constant 0 : i32
    return %1, %c0_i32 : i32, i32
  }
  func.func @transform_1(%arg0: i32, %arg1: i32) -> (i32, i32) {
    %c1_i32 = arith.constant 1 : i32
    %0 = arith.muli %arg0, %c1_i32 : i32
    %1 = arith.addi %0, %arg1 : i32
    %c0_i32 = arith.constant 0 : i32
    %c0_i32_0 = arith.constant 0 : i32
    return %1, %c0_i32 : i32, i32
  }
  func.func @transform_2(%arg0: i32, %arg1: i32) -> (i32, i32, i32, i32) {
    %c0_i32 = arith.constant 0 : i32
    %c0_i32_0 = arith.constant 0 : i32
    %c0_i32_1 = arith.constant 0 : i32
    %c0_i32_2 = arith.constant 0 : i32
    return %arg0, %c0_i32, %c0_i32_0, %c0_i32_1 : i32, i32, i32, i32
  }
}

</mosaic_0001>

<bundles_post_ra>
// kernel: tpu_custom_call.1
= control target key start
LH: loop header
LB: loop body
LE: loop exit
PB: predicated region body
PF: predicated region fallthrough
CT: control target
= control target key end

     0   :  { %7 = vsyncpa [#allocation3], 0  ;;  %s278_s0 = inlined_call_operand.hbm [shape: f32[16,128], index: 0, kind: input, shape index: {}]   ;;  %s279_s1 = inlined_call_operand.hbm [shape: f32[16,128], index: 1, kind: input, shape index: {}]   ;;  %s280_s2 = inlined_call_operand.hbm [shape: f32[1,2,8,128], index: 2, kind: output, shape index: {}]  }
   0x1   :  { %8 = vsyncpa [#allocation6], 0 }
   0x2   :  { %9 = vsyncpa [#allocation4], 0  ;;  %s213_s9 = smov [#allocation2]   ;;  %s141_s13 = scalar_lea.hbm %s278_s0, 256 }
   0x3   :  { %s19_s10 = sshll.u32 %s213_s9, 4  ;;  %p142_p0 = scmp.ne.s32.totalorder %s278_s0, %s141_s13  ;;  %s20_s10 = int_to_ptr.vmem [resolvable:$true] %s19_s10 }
   0x4   :  { %p145_p1 = scmp.lt.u32.totalorder %s141_s13, %s278_s0 }
   0x6   :  { %p147_p2 = pnand %p145_p1, %p142_p0 }
   0x8   :  { %150 = shalt.err (!%p147_p2)
}
   0x9   :  { %s151_s18 = scalar_lea.vmem %s20_s10, 256  ;;  %p156_p4 = scmp.lt.s32.totalorder %s20_s10, %s20_s10 }
   0xa   :  { %p152_p3 = scmp.ne.s32.totalorder %s20_s10, %s151_s18  ;;  %p157_p5 = scmp.lt.s32.totalorder %s151_s18, %s151_s18 }
   0xc   :  { %p158_p6 = por %p157_p5, %p156_p4 }
   0xe   :  { %p159_p7 = pnand %p158_p6, %p152_p3 }
  0x10   :  { %162 = shalt.err (!%p159_p7)
}
  0x11   :  { %s214_s19 = smov 128   ;;  %s215_s20 = smov 8  }
  0x12   :  { %25 = dma.hbm_to_vmem [thread:$0]  %s278_s0, 256, %s20_s10, [#allocation3], %s214_s19, %s214_s19, %s215_s20  }
  0x13   :  { %s216_s23 = smov [#allocation5]   ;;  %s163_s27 = scalar_lea.hbm %s279_s1, 256 }
  0x14   :  { %s35_s24 = sshll.u32 %s216_s23, 4  ;;  %p164_p8 = scmp.ne.s32.totalorder %s279_s1, %s163_s27  ;;  %s36_s24 = int_to_ptr.vmem [resolvable:$true] %s35_s24 }
  0x15   :  { %p167_p9 = scmp.lt.u32.totalorder %s163_s27, %s279_s1 }
  0x17   :  { %p169_p10 = pnand %p167_p9, %p164_p8 }
  0x19   :  { %172 = shalt.err (!%p169_p10)
}
  0x1a   :  { %s173_s4 = scalar_lea.vmem %s36_s24, 256  ;;  %p178_p12 = scmp.lt.s32.totalorder %s36_s24, %s36_s24 }
  0x1b   :  { %p174_p11 = scmp.ne.s32.totalorder %s36_s24, %s173_s4  ;;  %p179_p13 = scmp.lt.s32.totalorder %s173_s4, %s173_s4 }
  0x1d   :  { %p180_p0 = por %p179_p13, %p178_p12 }
  0x1f   :  { %p181_p1 = pnand %p180_p0, %p174_p11 }
  0x21   :  { %184 = shalt.err (!%p181_p1)
}
  0x22   :  { %41 = dma.hbm_to_vmem [thread:$0]  %s279_s1, 256, %s36_s24, [#allocation6], %s214_s19, %s214_s19, %s215_s20  }
  0x23   :  { %207 = dma.done.wait [#allocation3], 256  }
  0x24   :  { %208 = vsyncadd [#allocation3], 4294967040 }
  0x25   :  { %209 = dma.done.wait [#allocation6], 256  }
  0x26   :  { %210 = vsyncadd [#allocation6], 4294967040  ;;  %v58_v0 = vld [vmem:[#allocation2] sm:$0xff]  ;;  %v59_v1 = vld [vmem:[#allocation2 + $0x8] sm:$0xff]  ;;  %s217_s1 = smov [#allocation7]  }
  0x27   :  { %v60_v2 = vld [vmem:[#allocation5] sm:$0xff]  ;;  %v61_v3 = vld [vmem:[#allocation5 + $0x8] sm:$0xff]  ;;  %v68_v4 = vand.u32 2147483647, %v58_v0  ;;  %v69_v5 = vand.u32 2147483647, %v59_v1 }
  0x28   :  { %v96_v6 = vsub.f32 %v58_v0, %v60_v2  ;;  %v97_v7 = vsub.f32 %v59_v1, %v61_v3  ;;  %v62_v22 = vmax.f32 %v58_v0, 0.0  ;;  %v64_v23 = vmul.f32 %v60_v2, %v58_v0  ;;  %s114_s6 = sshll.u32 %s217_s1, 4  ;;  %s115_s6 = int_to_ptr.vmem [resolvable:$true] %s114_s6 }
  0x29   :  { %v70_v8 = vsub.f32 0.0, %v68_v4  ;;  %v71_v9 = vsub.f32 0.0, %v69_v5  ;;  %v63_v26 = vmax.f32 %v59_v1, 0.0  ;;  %v65_v27 = vmul.f32 %v61_v3, %v59_v1  ;;  %s185_s7 = scalar_lea.vmem %s115_s6, 256  ;;  %p190_p3 = scmp.lt.s32.totalorder %s115_s6, %s115_s6 }
  0x2a   :  { %v98_v10 = vmul.f32 %v96_v6, %v96_v6  ;;  %v99_v11 = vmul.f32 %v97_v7, %v97_v7  ;;  %v66_v31 = vsub.f32 %v62_v22, %v64_v23  ;;  %p186_p2 = scmp.ne.s32.totalorder %s115_s6, %s185_s7  ;;  %p191_p4 = scmp.lt.s32.totalorder %s185_s7, %s185_s7 }
  0x2b   :  { %v72_v12 = vmul.f32 1.442695, %v70_v8  ;;  %v74_v13 = vmul.f32 1.442695, %v71_v9  ;;  %v67_v34 = vsub.f32 %v63_v26, %v65_v27 }
  0x2c   :  { %v101_v14 = vadd.f32 %v99_v11, %v98_v10  ;;  %p192_p5 = por %p191_p4, %p190_p3 }
  0x2d   :  { %133 = vpow2.f32 %v72_v12 }
  0x2e   :  { %135 = vpow2.f32 %v74_v13  ;;  %108 = vst [vmem:[#allocation7 + $0x8] sm:$0xff] %v101_v14  ;;  %p193_p6 = pnand %p192_p5, %p186_p2 }
  0x37   :  { %v134_v15 = vpop.eup %133 }
  0x38   :  { %v136_v16 = vpop.eup %135  ;;  %v76_v17 = vadd.f32 1.0, %v134_v15  ;;  %v79_v19 = vmul.f32 -0.5, %v134_v15  ;;  %v82_v24 = vand.u32 2147483647, %v134_v15 }
  0x39   :  { %v85_v18 = vadd.f32 1.0, %v136_v16  ;;  %v88_v20 = vmul.f32 -0.5, %v136_v16  ;;  %v91_v28 = vand.u32 2147483647, %v136_v16 }
  0x3a   :  { %137 = vlog2.f32 %v76_v17  ;;  %v80_v21 = vadd.f32 1.0, %v79_v19  ;;  %vm83_vm0 = vcmp.lt.f32.partialorder %v82_v24, 0.0004427343 }
  0x3b   :  { %139 = vlog2.f32 %v85_v18  ;;  %v89_v25 = vadd.f32 1.0, %v88_v20  ;;  %vm92_vm1 = vcmp.lt.f32.partialorder %v91_v28, 0.0004427343 }
  0x3c   :  { %v81_v29 = vmul.f32 %v134_v15, %v80_v21 }
  0x3d   :  { %v90_v32 = vmul.f32 %v136_v16, %v89_v25 }
  0x44   :  { %v138_v30 = vpop.eup %137 }
  0x45   :  { %v140_v33 = vpop.eup %139  ;;  %v78_v35 = vmul.f32 0.6931472, %v138_v30 }
  0x46   :  { %v87_v36 = vmul.f32 0.6931472, %v140_v33 }
  0x47   :  { %v84_v37 = vsel %vm83_vm0, %v81_v29, %v78_v35 }
  0x48   :  { %v93_v38 = vsel %vm92_vm1, %v90_v32, %v87_v36  ;;  %v94_v39 = vadd.f32 %v84_v37, %v66_v31 }
  0x49   :  { %v95_v40 = vadd.f32 %v93_v38, %v67_v34 }
  0x4b   :  { %v100_v41 = vadd.f32 %v95_v40, %v94_v39 }
  0x4d   :  { %104 = vst [vmem:[#allocation7] sm:$0xff] %v100_v41 }
  0x4e   :  { %196 = shalt.err (!%p193_p6)
}
  0x4f   :  { %s197_s10 = scalar_lea.hbm %s280_s2, 256 }
  0x50   :  { %p198_p7 = scmp.ne.s32.totalorder %s280_s2, %s197_s10  ;;  %p201_p8 = scmp.lt.u32.totalorder %s197_s10, %s280_s2 }
  0x52   :  { %p203_p9 = pnand %p201_p8, %p198_p7 }
  0x54   :  { %206 = shalt.err (!%p203_p9)
}
  0x55   :  { %120 = dma.vmem_to_hbm [thread:$0]  %s115_s6, 256, %s280_s2, [#allocation4], %s214_s19, %s214_s19, %s215_s20  }
  0x56   :  { %211 = dma.done.wait [#allocation4], 256  }
  0x57   :  { %212 = vsyncadd [#allocation4], 4294967040 }
  0x58   :  { %124 = vsyncpa [#allocation3], 1 }
  0x59   :  { %125 = vsyncpa [#allocation6], 1 }
  0x5a   :  { %126 = vsyncpa [#allocation4], 1 }

</bundles_post_ra>
